<compile_context>
chip_gen: v6e
topology: v6e:2x2x1
jax: 0.10.0
libtpu: 0.0.40
codegen_flags: <defaults>
</compile_context>

<pallas_src>
import math

import jax
import jax.numpy as jnp
from jax import lax
from jax.experimental import pallas as pl
from jax.experimental.pallas import tpu as pltpu

# ---- model hyper-parameters (small, but consistent with the module) ----
EMBEDDING_DIM = 16     # E
HEAD_NUM = 2           # H
QKV_DIM = 8            # D
HD = HEAD_NUM * QKV_DIM
LOGIT_CLIPPING = 10.0

BATCH = 2              # B
GROUP = 8              # G (number of decoding "agents")
PROBLEM = 8            # P (number of nodes)

_MASK_NEG = -1e9       # additive mask value for cross-batch (off-block) entries


def _kp_decoder_kernel(x_ref, enc_ref, mask_ref,
                       wq_ref, wkv_ref, wc_w_ref, wc_b_ref,
                       probs_ref):
    """One batch block of BB elements.

    x_ref    : (BB*G, E+1)   [graph_embed | capacity] rows, batch-major
    enc_ref  : (BB*P, E)     encoded nodes, batch-major
    mask_ref : (BB*G, BB*P)  block-diagonal additive mask (-1e9 off the batch diagonal)
    wq_ref   : (E+1, H*D)
    wkv_ref  : (E, 2*H*D)    [Wk | Wv] fused
    wc_w_ref : (H*D, E)
    wc_b_ref : (1, E)
    probs_ref: (BB*G, BB*P)  full probability slab (off-batch columns come out 0)
    """
    x = x_ref[...]
    enc = enc_ref[...]
    mask = mask_ref[...]

    # Fused projections: BB*G / BB*P rows feed the MXU M dimension in one push each.
    q_full = jnp.dot(x, wq_ref[...], preferred_element_type=jnp.float32)      # (BBG, HD)
    kv_full = jnp.dot(enc, wkv_ref[...], preferred_element_type=jnp.float32)  # (BBP, 2HD)

    inv_sqrt_d = 1.0 / math.sqrt(QKV_DIM)
    nt = (((1,), (1,)), ((), ()))   # contract last dims of both operands: A @ B.T

    # Multi-head attention; output combine accumulated per head (no lane concatenate).
    mh = wc_b_ref[...]                                                         # (1, E) -> bcast
    for h in range(HEAD_NUM):                                                  # static unroll
        lo, hi = h * QKV_DIM, (h + 1) * QKV_DIM
        qh = q_full[:, lo:hi]                                                  # (BBG, D)
        kh = kv_full[:, lo:hi]                                                 # (BBP, D)
        vh = kv_full[:, HD + lo:HD + hi]                                       # (BBP, D)

        s = lax.dot_general(qh, kh, nt, preferred_element_type=jnp.float32)    # (BBG, BBP)
        s = s * inv_sqrt_d + mask
        s = s - jnp.max(s, axis=-1, keepdims=True)
        e = jnp.exp(s)
        w = e / jnp.sum(e, axis=-1, keepdims=True)

        out_h = jnp.dot(w.astype(vh.dtype), vh,
                        preferred_element_type=jnp.float32)                    # (BBG, D)
        mh = mh + jnp.dot(out_h, wc_w_ref[lo:hi, :],
                          preferred_element_type=jnp.float32)                  # (BBG, E)

    # Single-head pointer scores against the encoded nodes (dense across the block).
    score = lax.dot_general(mh.astype(enc.dtype), enc, nt,
                            preferred_element_type=jnp.float32)                # (BBG, BBP)
    score = LOGIT_CLIPPING * jnp.tanh(score * (1.0 / math.sqrt(EMBEDDING_DIM)))
    score = score + mask
    # No max-subtraction: |logit| <= LOGIT_CLIPPING and masked entries underflow to 0.
    e = jnp.exp(score)
    probs_ref[...] = e / jnp.sum(e, axis=-1, keepdims=True)


def kp_decoder_forward(graph, capacity, encoded_nodes, ninf_mask, params,
                       *, batch_block=None, compute_dtype=jnp.float32):
    """Builds flattened inputs + block-diagonal mask, launches the blocked kernel."""
    B, G = capacity.shape
    P, E = encoded_nodes.shape[1], encoded_nodes.shape[2]
    E1 = E + 1

    BB = B if batch_block is None else batch_block
    assert B % BB == 0, "batch size must be divisible by the batch block"
    nb = B // BB
    BBG, BBP = BB * G, BB * P

    # input1 = graph.expand(B, G, E); input2 = capacity[:, :, None]
    input_cat = jnp.concatenate(
        [jnp.broadcast_to(graph, (B, G, E)), capacity[:, :, None]], axis=2)
    x_flat = input_cat.reshape(B * G, E1).astype(compute_dtype)
    enc_flat = encoded_nodes.reshape(B * P, E).astype(compute_dtype)

    # Block-diagonal additive mask: within-batch entries carry ninf_mask, cross-batch
    # entries get -1e9 so their softmax weight underflows to exactly 0 and the dense
    # (BB*G, BB*P) attention reproduces per-batch attention.
    mblk = ninf_mask.astype(jnp.float32).reshape(nb, BB, G, P)
    same_batch = jnp.arange(BB)[:, None] == jnp.arange(BB)[None, :]            # (BB, BB)
    mask_full = jnp.where(same_batch[None, :, None, :, None],
                          mblk[:, :, :, None, :],
                          jnp.float32(_MASK_NEG))                              # (nb,BB,G,BB,P)
    mask_full = mask_full.reshape(B * G, BBP)

    # PyTorch nn.Linear stores weight as (out, in); kernel consumes (in, out).
    wq_t = params["Wq"].T.astype(compute_dtype)                                # (E1, HD)
    wkv_t = jnp.concatenate([params["Wk"].T, params["Wv"].T],
                            axis=1).astype(compute_dtype)                      # (E, 2*HD)
    wc_w_t = params["Wc"].T.astype(compute_dtype)                              # (HD, E)
    wc_b = params["Wc_b"][None, :].astype(compute_dtype)                       # (1, E)

    # Small weights: whole-array VMEM residents, no per-step pipelining.
    weight_spec = pl.BlockSpec(memory_space=pltpu.MemorySpace.VMEM)

    grid_spec = pltpu.PrefetchScalarGridSpec(
        num_scalar_prefetch=0,
        grid=(nb,),
        in_specs=[
            pl.BlockSpec((BBG, E1), lambda b: (b, 0)),
            pl.BlockSpec((BBP, E), lambda b: (b, 0)),
            pl.BlockSpec((BBG, BBP), lambda b: (b, 0)),
            weight_spec, weight_spec, weight_spec, weight_spec,
        ],
        out_specs=pl.BlockSpec((BBG, BBP), lambda b: (b, 0)),
    )

    probs_full = pl.pallas_call(
        _kp_decoder_kernel,
        out_shape=jax.ShapeDtypeStruct((B * G, BBP), jnp.float32),
        grid_spec=grid_spec,
        compiler_params=pltpu.CompilerParams(dimension_semantics=("parallel",)),
    )(x_flat, enc_flat, mask_full, wq_t, wkv_t, wc_w_t, wc_b)

    # Extract the per-batch diagonal (G, P) blocks of each (BB*G, BB*P) slab.
    r = probs_full.reshape(nb, BB, G, BB, P)
    idx = jnp.arange(BB)
    diag = r[:, idx, :, idx, :]                 # fancy axes move to front: (BB, nb, G, P)
    return diag.transpose(1, 0, 2, 3).reshape(B, G, P)


def kp_decoder_reference(graph, capacity, encoded_nodes, ninf_mask, params):
    """Pure-JAX reference mirroring the PyTorch forward, for verification."""
    B, G = capacity.shape
    E, H, D = EMBEDDING_DIM, HEAD_NUM, QKV_DIM
    input_cat = jnp.concatenate(
        [jnp.broadcast_to(graph, (B, G, E)), capacity[:, :, None]], axis=2)
    q = (input_cat @ params["Wq"].T).reshape(B, G, H, D).transpose(0, 2, 1, 3)
    k = (encoded_nodes @ params["Wk"].T).reshape(B, -1, H, D).transpose(0, 2, 1, 3)
    v = (encoded_nodes @ params["Wv"].T).reshape(B, -1, H, D).transpose(0, 2, 1, 3)
    score = jnp.einsum("bhgd,bhpd->bhgp", q, k) / math.sqrt(D)
    score = score + ninf_mask[:, None, :, :]
    w = jax.nn.softmax(score, axis=3)
    out = jnp.einsum("bhgp,bhpd->bhgd", w, v)
    out_concat = out.transpose(0, 2, 1, 3).reshape(B, G, H * D)
    mh = out_concat @ params["Wc"].T + params["Wc_b"]
    sc = jnp.einsum("bge,bpe->bgp", mh, encoded_nodes) / math.sqrt(E)
    sc = LOGIT_CLIPPING * jnp.tanh(sc) + ninf_mask
    return jax.nn.softmax(sc, axis=2)


if __name__ == "__main__":
    key = jax.random.PRNGKey(0)
    keys = jax.random.split(key, 9)

    # deterministic synthetic parameters (PyTorch nn.Linear layout: (out, in))
    params = {
        "Wq":   0.1 * jax.random.normal(keys[0], (HD, EMBEDDING_DIM + 1), jnp.float32),
        "Wk":   0.1 * jax.random.normal(keys[1], (HD, EMBEDDING_DIM), jnp.float32),
        "Wv":   0.1 * jax.random.normal(keys[2], (HD, EMBEDDING_DIM), jnp.float32),
        "Wc":   0.1 * jax.random.normal(keys[3], (EMBEDDING_DIM, HD), jnp.float32),
        "Wc_b": 0.1 * jax.random.normal(keys[4], (EMBEDDING_DIM,), jnp.float32),
    }

    graph = jax.random.normal(keys[5], (BATCH, 1, EMBEDDING_DIM), jnp.float32)
    capacity = jax.random.uniform(keys[6], (BATCH, GROUP), jnp.float32)
    encoded_nodes = jax.random.normal(keys[7], (BATCH, PROBLEM, EMBEDDING_DIM), jnp.float32)
    # additive mask: ~20% masked; keep at least one feasible node per row so the
    # max-free pointer softmax (and any real decoder) has a nonzero denominator.
    mask_bits = jax.random.bernoulli(keys[8], 0.2, (BATCH, GROUP, PROBLEM))
    mask_bits = mask_bits.at[:, :, 0].set(False)
    ninf_mask = jnp.where(mask_bits, jnp.float32(-1e9), jnp.float32(0.0))

    # --- config 1: whole batch in a single grid step (BB = B) ---
    probs = kp_decoder_forward(graph, capacity, encoded_nodes, ninf_mask, params)
    probs = jax.block_until_ready(probs)
    ref = kp_decoder_reference(graph, capacity, encoded_nodes, ninf_mask, params)
    assert probs.shape == (BATCH, GROUP, PROBLEM)
    assert jnp.allclose(probs, ref, atol=1e-5, rtol=1e-5), "mismatch vs reference (BB=B)"
    assert jnp.allclose(jnp.sum(probs, axis=2), 1.0, atol=1e-5)

    # --- config 2: B=4 split into two batch blocks (exercises grid > 1) ---
    B2 = 4
    k2 = jax.random.split(jax.random.PRNGKey(1), 4)
    graph2 = jax.random.normal(k2[0], (B2, 1, EMBEDDING_DIM), jnp.float32)
    capacity2 = jax.random.uniform(k2[1], (B2, GROUP), jnp.float32)
    encoded2 = jax.random.normal(k2[2], (B2, PROBLEM, EMBEDDING_DIM), jnp.float32)
    bits2 = jax.random.bernoulli(k2[3], 0.2, (B2, GROUP, PROBLEM))
    bits2 = bits2.at[:, :, 0].set(False)
    mask2 = jnp.where(bits2, jnp.float32(-1e9), jnp.float32(0.0))

    probs2 = kp_decoder_forward(graph2, capacity2, encoded2, mask2, params, batch_block=2)
    probs2 = jax.block_until_ready(probs2)
    ref2 = kp_decoder_reference(graph2, capacity2, encoded2, mask2, params)
    assert jnp.allclose(probs2, ref2, atol=1e-5, rtol=1e-5), "mismatch vs reference (BB<B)"
    assert jnp.allclose(jnp.sum(probs2, axis=2), 1.0, atol=1e-5)

    print("KERNEL_OK")
</pallas_src>

<mosaic_0001>
module attributes {stable_mosaic.version = 11 : i64} {
  func.func @_kp_decoder_kernel(%arg0: i32, %arg1: memref<16x17xf32, #tpu.memory_space<vmem>>, %arg2: memref<16x16xf32, #tpu.memory_space<vmem>>, %arg3: memref<16x16xf32, #tpu.memory_space<vmem>>, %arg4: memref<17x16xf32, #tpu.memory_space<vmem>>, %arg5: memref<16x32xf32, #tpu.memory_space<vmem>>, %arg6: memref<16x16xf32, #tpu.memory_space<vmem>>, %arg7: memref<1x16xf32, #tpu.memory_space<vmem>>, %arg8: memref<16x16xf32, #tpu.memory_space<vmem>>) attributes {dimension_semantics = [#tpu.dimension_semantics<parallel>], iteration_bounds = array<i64: 1>, scalar_prefetch = 0 : i64, scratch_operands = 0 : i64, tpu.core_type = #tpu.core_type<tc>, window_params = [{transform_indices = @transform_0, window_bounds = array<i64: 16, 17>}, {transform_indices = @transform_1, window_bounds = array<i64: 16, 16>}, {transform_indices = @transform_2, window_bounds = array<i64: 16, 16>}, {pipeline_mode = #tpu.pipeline_mode<synchronous>, transform_indices = @transform_3, window_bounds = array<i64: 17, 16>}, {pipeline_mode = #tpu.pipeline_mode<synchronous>, transform_indices = @transform_4, window_bounds = array<i64: 16, 32>}, {pipeline_mode = #tpu.pipeline_mode<synchronous>, transform_indices = @transform_5, window_bounds = array<i64: 16, 16>}, {pipeline_mode = #tpu.pipeline_mode<synchronous>, transform_indices = @transform_6, window_bounds = array<i64: 1, 16>}, {transform_indices = @transform_7, window_bounds = array<i64: 16, 16>}]} {
    %c0 = arith.constant 0 : index
    %c0_0 = arith.constant 0 : index
    %0 = vector.load %arg1[%c0, %c0_0] : memref<16x17xf32, #tpu.memory_space<vmem>>, vector<16x17xf32>
    %c0_1 = arith.constant 0 : index
    %c0_2 = arith.constant 0 : index
    %1 = vector.load %arg2[%c0_1, %c0_2] : memref<16x16xf32, #tpu.memory_space<vmem>>, vector<16x16xf32>
    %c0_3 = arith.constant 0 : index
    %c0_4 = arith.constant 0 : index
    %2 = vector.load %arg3[%c0_3, %c0_4] : memref<16x16xf32, #tpu.memory_space<vmem>>, vector<16x16xf32>
    %c0_5 = arith.constant 0 : index
    %c0_6 = arith.constant 0 : index
    %3 = vector.load %arg4[%c0_5, %c0_6] : memref<17x16xf32, #tpu.memory_space<vmem>>, vector<17x16xf32>
    %cst = arith.constant dense<0.000000e+00> : vector<16x16xf32>
    %4 = tpu.matmul %0, %3, %cst {dimension_numbers = #tpu.dot_dimension_numbers<[1], [0], [0], [1], [0, 0, 1, 1], [], []>} : vector<16x17xf32>, vector<17x16xf32>, vector<16x16xf32> -> vector<16x16xf32>
    %c0_7 = arith.constant 0 : index
    %c0_8 = arith.constant 0 : index
    %5 = vector.load %arg5[%c0_7, %c0_8] : memref<16x32xf32, #tpu.memory_space<vmem>>, vector<16x32xf32>
    %cst_9 = arith.constant dense<0.000000e+00> : vector<16x32xf32>
    %6 = tpu.matmul %1, %5, %cst_9 {dimension_numbers = #tpu.dot_dimension_numbers<[1], [0], [0], [1], [0, 0, 1, 1], [], []>} : vector<16x16xf32>, vector<16x32xf32>, vector<16x32xf32> -> vector<16x32xf32>
    %c0_10 = arith.constant 0 : index
    %c0_11 = arith.constant 0 : index
    %7 = vector.load %arg7[%c0_10, %c0_11] : memref<1x16xf32, #tpu.memory_space<vmem>>, vector<1x16xf32>
    %8 = vector.extract_strided_slice %4 {offsets = [0, 0], sizes = [16, 8], strides = [1, 1]} : vector<16x16xf32> to vector<16x8xf32>
    %9 = vector.extract_strided_slice %6 {offsets = [0, 0], sizes = [16, 8], strides = [1, 1]} : vector<16x32xf32> to vector<16x8xf32>
    %10 = vector.extract_strided_slice %6 {offsets = [0, 16], sizes = [16, 8], strides = [1, 1]} : vector<16x32xf32> to vector<16x8xf32>
    %cst_12 = arith.constant dense<0.000000e+00> : vector<16x16xf32>
    %11 = tpu.matmul %8, %9, %cst_12 {dimension_numbers = #tpu.dot_dimension_numbers<[1], [1], [0], [0], [0, 0, 1, 0], [], []>} : vector<16x8xf32>, vector<16x8xf32>, vector<16x16xf32> -> vector<16x16xf32>
    %cst_13 = arith.constant 0.353553385 : f32
    %12 = vector.broadcast %cst_13 : f32 to vector<16x16xf32>
    %13 = arith.mulf %11, %12 : vector<16x16xf32>
    %14 = arith.addf %13, %2 : vector<16x16xf32>
    %cst_14 = arith.constant dense<0xFF800000> : vector<16xf32>
    %15 = vector.multi_reduction <maximumf>, %14, %cst_14 [1] : vector<16x16xf32> to vector<16xf32>
    %16 = vector.shape_cast %15 : vector<16xf32> to vector<16x1xf32>
    %17 = vector.broadcast %16 : vector<16x1xf32> to vector<16x16xf32>
    %18 = arith.subf %14, %17 : vector<16x16xf32>
    %19 = math.exp %18 : vector<16x16xf32>
    %cst_15 = arith.constant dense<0.000000e+00> : vector<16xf32>
    %20 = vector.multi_reduction <add>, %19, %cst_15 [1] : vector<16x16xf32> to vector<16xf32>
    %21 = vector.shape_cast %20 : vector<16xf32> to vector<16x1xf32>
    %22 = vector.broadcast %21 : vector<16x1xf32> to vector<16x16xf32>
    %23 = arith.divf %19, %22 : vector<16x16xf32>
    %cst_16 = arith.constant dense<0.000000e+00> : vector<16x8xf32>
    %24 = tpu.matmul %23, %10, %cst_16 {dimension_numbers = #tpu.dot_dimension_numbers<[1], [0], [0], [1], [0, 0, 1, 1], [], []>} : vector<16x16xf32>, vector<16x8xf32>, vector<16x8xf32> -> vector<16x8xf32>
    %c0_17 = arith.constant 0 : index
    %c0_18 = arith.constant 0 : index
    %25 = vector.load %arg6[%c0_17, %c0_18] : memref<16x16xf32, #tpu.memory_space<vmem>>, vector<8x16xf32>
    %cst_19 = arith.constant dense<0.000000e+00> : vector<16x16xf32>
    %26 = tpu.matmul %24, %25, %cst_19 {dimension_numbers = #tpu.dot_dimension_numbers<[1], [0], [0], [1], [0, 0, 1, 1], [], []>} : vector<16x8xf32>, vector<8x16xf32>, vector<16x16xf32> -> vector<16x16xf32>
    %27 = vector.broadcast %7 : vector<1x16xf32> to vector<16x16xf32>
    %28 = arith.addf %27, %26 : vector<16x16xf32>
    %29 = vector.extract_strided_slice %4 {offsets = [0, 8], sizes = [16, 8], strides = [1, 1]} : vector<16x16xf32> to vector<16x8xf32>
    %30 = vector.extract_strided_slice %6 {offsets = [0, 8], sizes = [16, 8], strides = [1, 1]} : vector<16x32xf32> to vector<16x8xf32>
    %31 = vector.extract_strided_slice %6 {offsets = [0, 24], sizes = [16, 8], strides = [1, 1]} : vector<16x32xf32> to vector<16x8xf32>
    %cst_20 = arith.constant dense<0.000000e+00> : vector<16x16xf32>
    %32 = tpu.matmul %29, %30, %cst_20 {dimension_numbers = #tpu.dot_dimension_numbers<[1], [1], [0], [0], [0, 0, 1, 0], [], []>} : vector<16x8xf32>, vector<16x8xf32>, vector<16x16xf32> -> vector<16x16xf32>
    %cst_21 = arith.constant 0.353553385 : f32
    %33 = vector.broadcast %cst_21 : f32 to vector<16x16xf32>
    %34 = arith.mulf %32, %33 : vector<16x16xf32>
    %35 = arith.addf %34, %2 : vector<16x16xf32>
    %cst_22 = arith.constant dense<0xFF800000> : vector<16xf32>
    %36 = vector.multi_reduction <maximumf>, %35, %cst_22 [1] : vector<16x16xf32> to vector<16xf32>
    %37 = vector.shape_cast %36 : vector<16xf32> to vector<16x1xf32>
    %38 = vector.broadcast %37 : vector<16x1xf32> to vector<16x16xf32>
    %39 = arith.subf %35, %38 : vector<16x16xf32>
    %40 = math.exp %39 : vector<16x16xf32>
    %cst_23 = arith.constant dense<0.000000e+00> : vector<16xf32>
    %41 = vector.multi_reduction <add>, %40, %cst_23 [1] : vector<16x16xf32> to vector<16xf32>
    %42 = vector.shape_cast %41 : vector<16xf32> to vector<16x1xf32>
    %43 = vector.broadcast %42 : vector<16x1xf32> to vector<16x16xf32>
    %44 = arith.divf %40, %43 : vector<16x16xf32>
    %cst_24 = arith.constant dense<0.000000e+00> : vector<16x8xf32>
    %45 = tpu.matmul %44, %31, %cst_24 {dimension_numbers = #tpu.dot_dimension_numbers<[1], [0], [0], [1], [0, 0, 1, 1], [], []>} : vector<16x16xf32>, vector<16x8xf32>, vector<16x8xf32> -> vector<16x8xf32>
    %c8 = arith.constant 8 : index
    %c0_25 = arith.constant 0 : index
    %46 = vector.load %arg6[%c8, %c0_25] : memref<16x16xf32, #tpu.memory_space<vmem>>, vector<8x16xf32>
    %cst_26 = arith.constant dense<0.000000e+00> : vector<16x16xf32>
    %47 = tpu.matmul %45, %46, %cst_26 {dimension_numbers = #tpu.dot_dimension_numbers<[1], [0], [0], [1], [0, 0, 1, 1], [], []>} : vector<16x8xf32>, vector<8x16xf32>, vector<16x16xf32> -> vector<16x16xf32>
    %48 = arith.addf %28, %47 : vector<16x16xf32>
    %cst_27 = arith.constant dense<0.000000e+00> : vector<16x16xf32>
    %49 = tpu.matmul %48, %1, %cst_27 {dimension_numbers = #tpu.dot_dimension_numbers<[1], [1], [0], [0], [0, 0, 1, 0], [], []>} : vector<16x16xf32>, vector<16x16xf32>, vector<16x16xf32> -> vector<16x16xf32>
    %cst_28 = arith.constant 2.500000e-01 : f32
    %50 = vector.broadcast %cst_28 : f32 to vector<16x16xf32>
    %51 = arith.mulf %49, %50 : vector<16x16xf32>
    %52 = math.tanh %51 : vector<16x16xf32>
    %cst_29 = arith.constant 1.000000e+01 : f32
    %53 = vector.broadcast %cst_29 : f32 to vector<16x16xf32>
    %54 = arith.mulf %53, %52 : vector<16x16xf32>
    %55 = arith.addf %54, %2 : vector<16x16xf32>
    %56 = math.exp %55 : vector<16x16xf32>
    %cst_30 = arith.constant dense<0.000000e+00> : vector<16xf32>
    %57 = vector.multi_reduction <add>, %56, %cst_30 [1] : vector<16x16xf32> to vector<16xf32>
    %58 = vector.shape_cast %57 : vector<16xf32> to vector<16x1xf32>
    %59 = vector.broadcast %58 : vector<16x1xf32> to vector<16x16xf32>
    %60 = arith.divf %56, %59 : vector<16x16xf32>
    %c0_31 = arith.constant 0 : index
    %c0_32 = arith.constant 0 : index
    %61 = vector.load %arg8[%c0_31, %c0_32] : memref<16x16xf32, #tpu.memory_space<vmem>>, vector<16x16xf32>
    tpu.vector_store %arg8[%c0_31, %c0_32], %60 {strides = array<i32>} : memref<16x16xf32, #tpu.memory_space<vmem>>, vector<16x16xf32>,
    return
  }
  func.func @transform_0(%arg0: i32) -> (i32, i32) {
    %c0_i32 = arith.constant 0 : i32
    %c0_i32_0 = arith.constant 0 : i32
    return %arg0, %c0_i32 : i32, i32
  }
  func.func @transform_1(%arg0: i32) -> (i32, i32) {
    %c0_i32 = arith.constant 0 : i32
    %c0_i32_0 = arith.constant 0 : i32
    return %arg0, %c0_i32 : i32, i32
  }
  func.func @transform_2(%arg0: i32) -> (i32, i32) {
    %c0_i32 = arith.constant 0 : i32
    %c0_i32_0 = arith.constant 0 : i32
    return %arg0, %c0_i32 : i32, i32
  }
  func.func @transform_3(%arg0: i32) -> (i32, i32) {
    %c0_i32 = arith.constant 0 : i32
    %c0_i32_0 = arith.constant 0 : i32
    %c0_i32_1 = arith.constant 0 : i32
    return %c0_i32, %c0_i32_0 : i32, i32
  }
  func.func @transform_4(%arg0: i32) -> (i32, i32) {
    %c0_i32 = arith.constant 0 : i32
    %c0_i32_0 = arith.constant 0 : i32
    %c0_i32_1 = arith.constant 0 : i32
    return %c0_i32, %c0_i32_0 : i32, i32
  }
  func.func @transform_5(%arg0: i32) -> (i32, i32) {
    %c0_i32 = arith.constant 0 : i32
    %c0_i32_0 = arith.constant 0 : i32
    %c0_i32_1 = arith.constant 0 : i32
    return %c0_i32, %c0_i32_0 : i32, i32
  }
  func.func @transform_6(%arg0: i32) -> (i32, i32) {
    %c0_i32 = arith.constant 0 : i32
    %c0_i32_0 = arith.constant 0 : i32
    %c0_i32_1 = arith.constant 0 : i32
    return %c0_i32, %c0_i32_0 : i32, i32
  }
  func.func @transform_7(%arg0: i32) -> (i32, i32) {
    %c0_i32 = arith.constant 0 : i32
    %c0_i32_0 = arith.constant 0 : i32
    return %arg0, %c0_i32 : i32, i32
  }
}

</mosaic_0001>

<bundles_post_ra>
// kernel: tpu_custom_call.1
= control target key start
LH: loop header
LB: loop body
LE: loop exit
PB: predicated region body
PF: predicated region fallthrough
CT: control target
= control target key end

     0   :  { %12 = vsyncpa [#allocation3], 0  ;;  %s1323_s0 = inlined_call_operand.vmem [shape: f32[16,17], index: 0, kind: input, shape index: {}]   ;;  %s1324_s1 = inlined_call_operand.vmem [shape: f32[16,16], index: 1, kind: input, shape index: {}]   ;;  %s1325_s2 = inlined_call_operand.hbm [shape: f32[16,16], index: 2, kind: input, shape index: {}]   ;;  %s1326_s3 = inlined_call_operand.vmem [shape: f32[17,16], index: 3, kind: input, shape index: {}]   ;;  %s1327_s4 = inlined_call_operand.hbm [shape: f32[16,32], index: 4, kind: input, shape index: {}]   ;;  %s1328_s5 = inlined_call_operand.vmem [shape: f32[16,16], index: 5, kind: input, shape index: {}]   ;;  %s1329_s6 = inlined_call_operand.vmem [shape: f32[1,16], index: 6, kind: input, shape index: {}]   ;;  %s1330_s7 = inlined_call_operand.hbm [shape: f32[16,16], index: 7, kind: output, shape index: {}]  }
   0x1   :  { %13 = vsyncpa [#allocation6], 0 }
   0x2   :  { %14 = vsyncpa [#allocation4], 0  ;;  %s1161_s24 = smov [#allocation2]  }
   0x3   :  { %s24_s25 = sshll.u32 %s1161_s24, 4  ;;  %s25_s25 = int_to_ptr.vmem [resolvable:$true] %s24_s25 }
   0x4   :  { %s1103_s26 = scalar_lea.vmem %s25_s25, 256  ;;  %p1108_p1 = scmp.lt.s32.totalorder %s25_s25, %s25_s25 }
   0x5   :  { %p1104_p0 = scmp.ne.s32.totalorder %s25_s25, %s1103_s26  ;;  %p1109_p2 = scmp.lt.s32.totalorder %s1103_s26, %s1103_s26 }
   0x7   :  { %p1110_p3 = por %p1109_p2, %p1108_p1 }
   0x9   :  { %p1111_p4 = pnand %p1110_p3, %p1104_p0 }
   0xb   :  { %1114 = shalt.err (!%p1111_p4)
}
   0xc   :  { %s1162_s27 = smov 128   ;;  %s1163_s28 = smov 8  }
   0xd   :  { %30 = dma.hbm_to_vmem [thread:$0]  %s1325_s2, 256, %s25_s25, [#allocation3], %s1162_s27, %s1162_s27, %s1163_s28  }
   0xe   :  { %s1164_s8 = smov [#allocation5]  }
   0xf   :  { %s38_s9 = sshll.u32 %s1164_s8, 4  ;;  %s39_s9 = int_to_ptr.vmem [resolvable:$true] %s38_s9 }
  0x10   :  { %s1123_s10 = scalar_lea.vmem %s39_s9, 256  ;;  %p1128_p6 = scmp.lt.s32.totalorder %s39_s9, %s39_s9 }
  0x11   :  { %p1124_p5 = scmp.ne.s32.totalorder %s39_s9, %s1123_s10  ;;  %p1129_p7 = scmp.lt.s32.totalorder %s1123_s10, %s1123_s10 }
  0x13   :  { %p1130_p8 = por %p1129_p7, %p1128_p6 }
  0x15   :  { %p1131_p9 = pnand %p1130_p8, %p1124_p5 }
  0x17   :  { %1134 = shalt.err (!%p1131_p9)
}
  0x18   :  { %44 = dma.hbm_to_vmem [thread:$0]  %s1327_s4, 256, %s39_s9, [#allocation6], %s1162_s27, %s1162_s27, %s1163_s28  }
  0x19   :  { %1155 = dma.done.wait [#allocation3], 256  }
  0x1a   :  { %1156 = vsyncadd [#allocation3], 4294967040 }
  0x1b   :  { %1157 = dma.done.wait [#allocation6], 256  }
  0x1c   :  { %1158 = vsyncadd [#allocation6], 4294967040  ;;  %vm71_vm0 = vcmask 1040384   ;;  %vm64_vm1 = vcmask 138240   ;;  %v63_v0 = vld [vmem:[%s1326_s3 + $0x10] sm:$0x1] }
  0x1d   :  { %v62_v1 = vld [vmem:[%s1326_s3 + $0x8] sm:$0xff]  ;;  %998 = vmatprep.subr.msk.mxu0 %vm71_vm0, %v63_v0  ;;  %v55_v2 = vld [vmem:[%s1323_s0] sm:$0xff]  ;;  %v151_v5 = vld [vmem:[#allocation5 + $0x8] sm:$0xff]  ;;  %vm152_vm2 = vcmask 130048   ;;  %vm235_vm3 = vcmask 64512   ;;  %s1167_s24 = smov 104  }
  0x1e   :  { %999 = vmatpush3.msk.msra.mxu0 %vm71_vm0, %v63_v0  ;;  %v61_v3 = vld [vmem:[%s1326_s3] sm:$0xff]  ;;  %1004 = vmatprep.mubr.msk.f32.mxu0 %vm64_vm1, %v55_v2  ;;  %v56_v4 = vld [vmem:[%s1323_s0 + $0x8] sm:$0xff]  ;;  %v150_v7 = vld [vmem:[#allocation5] sm:$0xff]  ;;  %s1165_s0 = smov 120  }
  0x1f   :  { %1000 = vmatprep.subr.mxu0 %v62_v1  ;;  %v57_v6 = vld [vmem:[%s1324_s1] sm:$0xff]  ;;  %v58_v8 = vld [vmem:[%s1324_s1 + $0x8] sm:$0xff]  ;;  %s1166_s1 = smov 112  }
  0x20   :  { %1001 = vmatpush3.msra.mxu0 %v62_v1  ;;  %v1272_v18 = vld [vmem:[#allocation2 + $0x8] sm:$0xff]  ;;  %v1274_v21 = vld [vmem:[#allocation2] sm:$0xff] }
  0x21   :  { %1002 = vmatprep.subr.mxu0 %v61_v3  ;;  %v436_v54 = vld [vmem:[%s1328_s5] sm:$0xff] }
  0x22   :  { %1003 = vmatpush3.msra.mxu0 %v61_v3 }
  0x23   :  { %1005 = vmatmul.mubr.msk.f32.vlgmr.msra.gmra.mxu0 %vm64_vm1, %v56_v4  ;;  %1007 = vmatprep.subr.mxu0 %v151_v5 }
  0x24   :  { %1008 = vmatpush3.msra.mxu0 %v151_v5  ;;  %1011 = vmatprep.mubr.msk.f32.mxu0 %vm152_vm2, %v57_v6 }
  0x25   :  { %1009 = vmatprep.subr.mxu0 %v150_v7 }
  0x26   :  { %1010 = vmatpush3.msra.mxu0 %v150_v7 }
  0x27   :  { %1012 = vmatmul.mubr.msk.f32.vlgmr.msra.gmra.mxu0 %vm152_vm2, %v58_v8 }
  0xe3   :  { %v1006_v9 = vpop.f32.mrf.mxu0 }
  0xe5   :  { %v141_v10 = vpop.f32.mrf.mxu0 }
  0xe6   :  { %526 = vrot.lane.b32.xlu1 %v141_v10, %s1165_s0  ;;  %1018 = vmatprep.mubr.msk.f32.mxu1 %vm235_vm3, %v141_v10  ;;  %v730_v10 = vld [vmem:[%s1328_s5 + $0x8] sm:$0xff]  ;;  %s1168_s5 = smov [#allocation7]  }
  0xe7   :  { %v1247_v11 = vpop.f32.mrf.mxu0 }
  0xe8   :  { %532 = vrot.lane.b32.xlu0 %v1247_v11, %s1165_s0  ;;  %1014 = vmatprep.subr.msk.mxu1 %vm235_vm3, %v1247_v11 }
  0xe9   :  { %v1252_v12 = vpop.f32.mrf.mxu0  ;;  %1015 = vmatpush3.xpose.msk.msra.mxu1 %vm235_vm3, %v1247_v11 }
  0xea   :  { %528 = vrot.lane.b32.xlu1 %v1006_v9, %s1165_s0  ;;  %1016 = vmatprep.subr.msk.mxu1 %vm235_vm3, %v1252_v12 }
  0xec   :  { %530 = vrot.lane.b32.xlu0 %v1252_v12, %s1165_s0 }
  0xed   :  { %1017 = vmatpush3.xpose.msk.msra.mxu1 %vm235_vm3, %v1252_v12 }
  0xf0   :  { %1019 = vmatmul.mubr.msk.f32.vlgmr.msra.gmra.mxu1 %vm235_vm3, %v1006_v9 }
 0x158   :  { %v527_v13 = vpop.permute.xlu1 %526 }
 0x159   :  { %1037 = vmatprep.mubr.msk.f32.mxu1 %vm235_vm3, %v527_v13 }
 0x15a   :  { %v533_v14 = vpop.permute.xlu0 %532 }
 0x15b   :  { %1033 = vmatprep.subr.msk.mxu1 %vm235_vm3, %v533_v14 }
 0x15c   :  { %1034 = vmatpush3.xpose.msk.msra.mxu1 %vm235_vm3, %v533_v14  ;;  %v529_v16 = vpop.permute.xlu1 %528 }
 0x15e   :  { %v531_v15 = vpop.permute.xlu0 %530 }
 0x15f   :  { %1035 = vmatprep.subr.msk.mxu1 %vm235_vm3, %v531_v15 }
 0x160   :  { %1036 = vmatpush3.xpose.msk.msra.mxu1 %vm235_vm3, %v531_v15  ;;  %v950_v15 = vld [vmem:[%s1329_s6] ss:$0 sm:$0xff]  ;;  %s924_s6 = sshll.u32 %s1168_s5, 4  ;;  %s925_s6 = int_to_ptr.vmem [resolvable:$true] %s924_s6 }
 0x161   :  { %1052 = vmatprep.subr.msk.mxu1 %vm152_vm2, %v58_v8  ;;  %s1135_s10 = scalar_lea.vmem %s925_s6, 256  ;;  %p1140_p11 = scmp.lt.s32.totalorder %s925_s6, %s925_s6 }
 0x162   :  { %p1136_p10 = scmp.ne.s32.totalorder %s925_s6, %s1135_s10  ;;  %p1141_p12 = scmp.lt.s32.totalorder %s1135_s10, %s1135_s10 }
 0x163   :  { %1038 = vmatmul.mubr.msk.f32.vlgmr.msra.gmra.mxu1 %vm235_vm3, %v529_v16 }
 0x164   :  { %1053 = vmatpush3.xpose.msk.msra.mxu1 %vm152_vm2, %v58_v8  ;;  %p1142_p13 = por %p1141_p12, %p1140_p11 }
 0x165   :  { %1054 = vmatprep.subr.msk.mxu1 %vm152_vm2, %v57_v6 }
 0x166   :  { %p1143_p0 = pnand %p1142_p13, %p1136_p10 }
 0x168   :  { %1055 = vmatpush3.xpose.msk.msra.mxu1 %vm152_vm2, %v57_v6 }
 0x1b0   :  { %v1020_v17 = vpop.f32.mrf.mxu1 }
 0x1b1   :  { %v324_v19 = vmul.f32 0.35355338, %v1020_v17 }
 0x1b2   :  { %v314_v20 = vpop.f32.mrf.mxu1 }
 0x1b3   :  { %v323_v22 = vmul.f32 0.35355338, %v314_v20  ;;  %v326_v23 = vadd.f32 %v324_v19, %v1272_v18 }
 0x1b5   :  { %v330_v24 = vsel %vm152_vm2, %v326_v23, -inf  ;;  %v325_v25 = vadd.f32 %v323_v22, %v1274_v21 }
 0x1b6   :  { %331 = vmax.xlane.f32.xlu1 %v330_v24 }
 0x1b7   :  { %v327_v26 = vsel %vm152_vm2, %v325_v25, -inf }
 0x1b8   :  { %328 = vmax.xlane.f32.xlu0 %v327_v26 }
 0x1c7   :  { %351 = vrot.lane.b32.xlu1 %v1247_v11, %s1166_s1 }
 0x223   :  { %v1039_v27 = vpop.f32.mrf.mxu1 }
 0x224   :  { %v618_v43 = vmul.f32 0.35355338, %v1039_v27 }
 0x225   :  { %v608_v28 = vpop.f32.mrf.mxu1 }
 0x226   :  { %v617_v29 = vmul.f32 0.35355338, %v608_v28  ;;  %v620_v44 = vadd.f32 %v618_v43, %v1272_v18 }
 0x228   :  { %v619_v30 = vadd.f32 %v617_v29, %v1274_v21  ;;  %v624_v45 = vsel %vm152_vm2, %v620_v44, -inf }
 0x22a   :  { %v621_v31 = vsel %vm152_vm2, %v619_v30, -inf }
 0x22b   :  { %622 = vmax.xlane.f32.xlu1 %v621_v31 }
 0x23f   :  { %v332_v32 = vpop.xlane.xlu1 %331 }
 0x240   :  { %v334_v33 = vsub.f32 %v326_v23, %v332_v32 }
 0x241   :  { %v329_v34 = vpop.xlane.xlu0 %328 }
 0x242   :  { %v337_v35 = vmul.f32 1.442695, %v334_v33  ;;  %v333_v36 = vsub.f32 %v325_v25, %v329_v34 }
 0x243   :  { %v352_v37 = vpop.permute.xlu1 %351 }
 0x244   :  { %1067 = vpow2.f32 %v337_v35  ;;  %v335_v38 = vmul.f32 1.442695, %v333_v36  ;;  %1021 = vmatprep.subr.mxu0 %v352_v37 }
 0x245   :  { %1022 = vmatpush3.msra.mxu0 %v352_v37 }
 0x246   :  { %1069 = vpow2.f32 %v335_v38 }
 0x251   :  { %v1068_v39 = vpop.eup %1067 }
 0x252   :  { %v342_v40 = vsel %vm152_vm2, %v1068_v39, 0.0 }
 0x253   :  { %v1070_v41 = vpop.eup %1069  ;;  %343 = vadd.xlane.f32.xlu0 %v342_v40 }
 0x254   :  { %v339_v42 = vsel %vm152_vm2, %v1070_v41, 0.0 }
 0x257   :  { %340 = vadd.xlane.f32.xlu0 %v339_v42 }
 0x26d   :  { %349 = vrot.lane.b32.xlu0 %v1252_v12, %s1166_s1 }
 0x28c   :  { %625 = vmax.xlane.f32.xlu0 %v624_v45 }
 0x2b4   :  { %v623_v46 = vpop.xlane.xlu1 %622 }
 0x2b5   :  { %v627_v47 = vsub.f32 %v619_v30, %v623_v46 }
 0x2b7   :  { %v629_v48 = vmul.f32 1.442695, %v627_v47 }
 0x2b9   :  { %1071 = vpow2.f32 %v629_v48 }
 0x2c6   :  { %v1072_v49 = vpop.eup %1071 }
 0x2c7   :  { %v633_v50 = vsel %vm152_vm2, %v1072_v49, 0.0 }
 0x2c8   :  { %634 = vadd.xlane.f32.xlu1 %v633_v50 }
 0x2d9   :  { %645 = vrot.lane.b32.xlu1 %v1247_v11, %s1167_s24 }
 0x2dc   :  { %v344_v51 = vpop.xlane.xlu0 %343 }
 0x2dd   :  { %1073 = vrcp.f32 %v344_v51 }
 0x2e0   :  { %v341_v52 = vpop.xlane.xlu0 %340 }
 0x2e1   :  { %1075 = vrcp.f32 %v341_v52 }
 0x2e4   :  { %v350_v53 = vpop.permute.xlu0 %349 }
 0x2e5   :  { %1023 = vmatprep.subr.mxu0 %v350_v53 }
 0x2e6   :  { %1024 = vmatpush3.msra.mxu0 %v350_v53 }
 0x2e7   :  { %1028 = vmatprep.subr.mxu0 %v436_v54 }
 0x2ea   :  { %v1074_v55 = vpop.eup %1073 }
 0x2eb   :  { %v348_v58 = vmul.f32 %v1074_v55, %v1068_v39 }
 0x2ee   :  { %v1076_v56 = vpop.eup %1075 }
 0x2ef   :  { %v346_v57 = vmul.f32 %v1076_v56, %v1070_v41 }
 0x2f1   :  { %1025 = vmatprep.mubr.msk.f32.mxu0 %vm152_vm2, %v346_v57 }
 0x2f2   :  { %1026 = vmatmul.mubr.msk.f32.vlgmr.msra.gmra.mxu0 %vm152_vm2, %v348_v58 }
 0x2f3   :  { %1029 = vmatpush3.msra.mxu0 %v436_v54 }
 0x315   :  { %v626_v59 = vpop.xlane.xlu0 %625 }
 0x316   :  { %v628_v60 = vsub.f32 %v620_v44, %v626_v59 }
 0x318   :  { %v631_v61 = vmul.f32 1.442695, %v628_v60 }
 0x31a   :  { %1077 = vpow2.f32 %v631_v61 }
 0x327   :  { %v1078_v62 = vpop.eup %1077 }
 0x328   :  { %v636_v63 = vsel %vm152_vm2, %v1078_v62, 0.0 }
 0x329   :  { %637 = vadd.xlane.f32.xlu0 %v636_v63 }
 0x33f   :  { %643 = vrot.lane.b32.xlu0 %v1252_v12, %s1167_s24 }
 0x351   :  { %v635_v0 = vpop.xlane.xlu1 %634 }
 0x352   :  { %1079 = vrcp.f32 %v635_v0 }
 0x355   :  { %v646_v1 = vpop.permute.xlu1 %645 }
 0x356   :  { %1040 = vmatprep.subr.mxu0 %v646_v1 }
 0x35f   :  { %v1080_v2 = vpop.eup %1079 }
 0x360   :  { %v640_v6 = vmul.f32 %v1080_v2, %v1072_v49 }
 0x3b2   :  { %v1027_v3 = vpop.f32.mrf.mxu0  ;;  %v638_v4 = vpop.xlane.xlu0 %637 }
 0x3b3   :  { %1081 = vrcp.f32 %v638_v4 }
 0x3b4   :  { %v427_v5 = vpop.f32.mrf.mxu0 }
 0x3b5   :  { %1030 = vmatprep.mubr.msk.f32.mxu0 %vm235_vm3, %v427_v5 }
 0x3b6   :  { %1031 = vmatmul.mubr.msk.f32.vlgmr.msra.gmra.mxu0 %vm235_vm3, %v1027_v3  ;;  %v644_v7 = vpop.permute.xlu0 %643 }
 0x3b7   :  { %1041 = vmatpush3.msra.mxu0 %v646_v1  ;;  %1044 = vmatprep.mubr.msk.f32.mxu0 %vm152_vm2, %v640_v6 }
 0x3b8   :  { %1042 = vmatprep.subr.mxu0 %v644_v7 }
 0x3b9   :  { %1043 = vmatpush3.msra.mxu0 %v644_v7 }
 0x3ba   :  { %1047 = vmatprep.subr.mxu0 %v730_v10 }
 0x3c0   :  { %v1082_v8 = vpop.eup %1081 }
 0x3c1   :  { %v642_v9 = vmul.f32 %v1082_v8, %v1078_v62 }
 0x3c3   :  { %1045 = vmatmul.mubr.msk.f32.vlgmr.msra.gmra.mxu0 %vm152_vm2, %v642_v9 }
 0x3c4   :  { %1048 = vmatpush3.msra.mxu0 %v730_v10 }
 0x476   :  { %v1032_v11 = vpop.f32.mrf.mxu0 }
 0x477   :  { %v525_v19 = vadd.f32 %v1032_v11, %v950_v15 }
 0x478   :  { %v509_v12 = vpop.f32.mrf.mxu0 }
 0x479   :  { %v524_v17 = vadd.f32 %v950_v15, %v509_v12 }
 0x483   :  { %v1046_v13 = vpop.f32.mrf.mxu0 }
 0x485   :  { %v721_v14 = vpop.f32.mrf.mxu0 }
 0x486   :  { %1049 = vmatprep.mubr.msk.f32.mxu0 %vm235_vm3, %v721_v14 }
 0x487   :  { %1050 = vmatmul.mubr.msk.f32.vlgmr.msra.gmra.mxu0 %vm235_vm3, %v1046_v13 }
 0x547   :  { %v1051_v16 = vpop.f32.mrf.mxu0 }
 0x548   :  { %v813_v23 = vadd.f32 %v1051_v16, %v525_v19 }
 0x549   :  { %v803_v20 = vpop.f32.mrf.mxu0 }
 0x54a   :  { %v812_v22 = vadd.f32 %v803_v20, %v524_v17 }
 0x54c   :  { %1056 = vmatprep.mubr.msk.f32.mxu1 %vm152_vm2, %v812_v22 }
 0x54d   :  { %1057 = vmatmul.mubr.msk.f32.vlgmr.msra.gmra.mxu1 %vm152_vm2, %v813_v23 }
 0x60d   :  { %v1058_v24 = vpop.f32.mrf.mxu1 }
 0x60e   :  { %v896_v25 = vmul.f32 0.25, %v1058_v24 }
 0x60f   :  { %v886_v26 = vpop.f32.mrf.mxu1 }
 0x610   :  { %1083 = vtanh.f32 %v896_v25  ;;  %v895_v27 = vmul.f32 0.25, %v886_v26 }
 0x612   :  { %1085 = vtanh.f32 %v895_v27 }
 0x61d   :  { %v1084_v28 = vpop.eup %1083 }
 0x61e   :  { %v900_v29 = vmul.f32 10.0, %v1084_v28 }
 0x61f   :  { %v1086_v30 = vpop.eup %1085 }
 0x620   :  { %v902_v31 = vadd.f32 %v900_v29, %v1272_v18  ;;  %v899_v32 = vmul.f32 10.0, %v1086_v30 }
 0x622   :  { %v905_v33 = vmul.f32 1.442695, %v902_v31  ;;  %v901_v34 = vadd.f32 %v899_v32, %v1274_v21 }
 0x624   :  { %1087 = vpow2.f32 %v905_v33  ;;  %v903_v35 = vmul.f32 1.442695, %v901_v34 }
 0x626   :  { %1089 = vpow2.f32 %v903_v35 }
 0x631   :  { %v1088_v36 = vpop.eup %1087 }
 0x632   :  { %v910_v37 = vsel %vm152_vm2, %v1088_v36, 0.0 }
 0x633   :  { %v1090_v38 = vpop.eup %1089  ;;  %911 = vadd.xlane.f32.xlu0 %v910_v37 }
 0x634   :  { %v907_v39 = vsel %vm152_vm2, %v1090_v38, 0.0 }
 0x635   :  { %908 = vadd.xlane.f32.xlu1 %v907_v39 }
 0x6bc   :  { %v912_v40 = vpop.xlane.xlu0 %911 }
 0x6bd   :  { %1091 = vrcp.f32 %v912_v40 }
 0x6be   :  { %v909_v41 = vpop.xlane.xlu1 %908 }
 0x6bf   :  { %1093 = vrcp.f32 %v909_v41 }
 0x6ca   :  { %v1092_v18 = vpop.eup %1091 }
 0x6cb   :  { %v916_v42 = vmul.f32 %v1092_v18, %v1088_v36 }
 0x6cc   :  { %v1094_v21 = vpop.eup %1093 }
 0x6cd   :  { %v914_v43 = vmul.f32 %v1094_v21, %v1090_v38  ;;  %918 = vst.msk [vmem:[#allocation7 + $0x8] sm:$0xff] %vm152_vm2, %v916_v42 }
 0x6cf   :  { %917 = vst.msk [vmem:[#allocation7] sm:$0xff] %vm152_vm2, %v914_v43 }
 0x6d0   :  { %1146 = shalt.err (!%p1143_p0)
}
 0x6d1   :  { %930 = dma.vmem_to_hbm [thread:$0]  %s925_s6, 256, %s1330_s7, [#allocation4], %s1162_s27, %s1162_s27, %s1163_s28  }
 0x6d2   :  { %1159 = dma.done.wait [#allocation4], 256  }
 0x6d3   :  { %1160 = vsyncadd [#allocation4], 4294967040 }
 0x6d4   :  { %934 = vsyncpa [#allocation3], 1 }
 0x6d5   :  { %935 = vsyncpa [#allocation6], 1 }
 0x6d6   :  { %936 = vsyncpa [#allocation4], 1 }

</bundles_post_ra>
